<compile_context>
chip_gen: v7x
topology: tpu7x:2x2x1
jax: 0.10.0
libtpu: 0.0.40
codegen_flags: <defaults>
</compile_context>

<pallas_src>
import functools

import jax
import jax.numpy as jnp
from jax.experimental import pallas as pl
from jax.experimental.pallas import tpu as pltpu


def _output_transition_kernel(w_ref, b_ref, x_ref, o_ref, *,
                              apply_sigmoid, approx_sigmoid):
    # w_ref: (C_out, C_in) SMEM, b_ref: (C_out,) SMEM
    # x_ref: (C_in, T_r, T_l) VMEM block, o_ref: (C_out, T_r, T_l) VMEM block
    c_out, c_in = w_ref.shape
    x = x_ref[...].astype(jnp.float32)            # one dense load of the block

    for o in range(c_out):                        # unrolled at trace time (small)
        # VPU FMAs on dense (T_r, T_l) planes; f32 accumulation.
        y = w_ref[o, 0] * x[0]
        for c in range(1, c_in):
            y = y + w_ref[o, c] * x[c]
        y = y + b_ref[o]
        if apply_sigmoid:
            # exp -> EUP, reciprocal -> EUP (approx) / exact; no VPU divide.
            y = pl.reciprocal(1.0 + jnp.exp(-y), approx=approx_sigmoid)
        # Direct per-channel store: no concat, no sublane merges, no temporary.
        o_ref[o] = y.astype(o_ref.dtype)


def _pick_row_tile(n_rows, c_in, n_batch, itemsize,
                   target_bytes, min_parallel_steps):
    """Rows-per-block for the dense (rows, 128) layout (multiple of 8)."""
    if n_rows <= 8:
        return n_rows                              # full extent -> always legal
    per_row_bytes = c_in * 128 * itemsize
    t = max(8, min(target_bytes // per_row_bytes, n_rows) // 8 * 8)
    # Keep enough grid steps so the v7x megacore (2 TCs) has parallel work.
    while n_batch * pl.cdiv(n_rows, t) < min_parallel_steps and t > 8:
        t = max(8, (t // 2) // 8 * 8)
    return t


def _pick_lane_tile(n_lanes, c_in, n_batch, itemsize,
                    target_bytes, min_parallel_steps):
    """Lanes-per-block for the fallback lane-only layout (multiple of 128)."""
    if n_lanes <= 128:
        return n_lanes                             # full extent -> always legal
    per_lane_bytes = c_in * itemsize
    t = max(128, min(target_bytes // per_lane_bytes, n_lanes) // 128 * 128)
    while n_batch * pl.cdiv(n_lanes, t) < min_parallel_steps and t > 128:
        t = max(128, (t // 2) // 128 * 128)
    return t


def output_transition(x_nchw, weight, bias, *, apply_sigmoid=True,
                      approx_sigmoid=True, target_block_bytes=2 << 20,
                      min_parallel_steps=8):
    """Pallas equivalent of OutputTransition.forward.

    x_nchw : (N, C_in, H, W)          float32 or bfloat16
    weight : (C_out, C_in, 1, 1)      (PyTorch Conv2d weight layout)
    bias   : (C_out,)
    returns: (N, C_out, H, W) with x_nchw's dtype
    """
    N, C_in, H, W = x_nchw.shape
    C_out = weight.shape[0]
    HW = H * W
    itemsize = jnp.dtype(x_nchw.dtype).itemsize

    # Params: flatten for SMEM residency; compute in f32.
    w_mat = weight.reshape(C_out, C_in).astype(jnp.float32)
    b_vec = bias.reshape(C_out).astype(jnp.float32)

    if HW % 128 == 0:
        # Sublane+lane dense layout: (N, C_in, HW//128, 128), pure reshape.
        R, L = HW // 128, 128
        t_r = _pick_row_tile(R, C_in, N, itemsize,
                             target_block_bytes, min_parallel_steps)
        t_l = L
        n_blocks = pl.cdiv(R, t_r)
        index_map = lambda n, j: (n, 0, j, 0)      # tile along the rows axis
    else:
        # TODO(synk): HW % 128 != 0 falls back to a lane-only layout
        # (rows=1); sublane-sparse but correct.
        R, L = 1, HW
        t_r = R
        t_l = _pick_lane_tile(L, C_in, N, itemsize,
                              target_block_bytes, min_parallel_steps)
        n_blocks = pl.cdiv(L, t_l)
        index_map = lambda n, j: (n, 0, 0, j)      # tile along the lane axis

    x4 = x_nchw.reshape(N, C_in, R, L)             # transpose-free

    kernel = functools.partial(_output_transition_kernel,
                               apply_sigmoid=apply_sigmoid,
                               approx_sigmoid=approx_sigmoid)

    # Double-buffered VMEM footprint: 2 * (C_in + C_out) * t_r * t_l * itemsize
    # (<~7 MiB at the 2 MiB input target) -> comfortably inside the default
    # scoped-VMEM limit on v5e/v6e/v7x; no explicit vmem_limit_bytes needed.
    out4 = pl.pallas_call(
        kernel,
        out_shape=jax.ShapeDtypeStruct((N, C_out, R, L), x_nchw.dtype),
        grid_spec=pltpu.PrefetchScalarGridSpec(
            num_scalar_prefetch=0,
            grid=(N, n_blocks),
            in_specs=[
                # Tiny weight / bias live in SMEM; read as scalars in-kernel.
                pl.BlockSpec(memory_space=pltpu.MemorySpace.SMEM),
                pl.BlockSpec(memory_space=pltpu.MemorySpace.SMEM),
                # x: one (C_in, t_r, t_l) dense block per (batch, tile) step.
                pl.BlockSpec((pl.Squeezed(), C_in, t_r, t_l), index_map),
            ],
            out_specs=pl.BlockSpec((pl.Squeezed(), C_out, t_r, t_l), index_map),
        ),
        compiler_params=pltpu.CompilerParams(
            dimension_semantics=("parallel", "parallel")),
    )(w_mat, b_vec, x4)

    return out4.reshape(N, C_out, H, W)            # transpose-free


if __name__ == "__main__":
    # Small shapes consistent with the module: batch=2, inplanes=4,
    # spatial=16x16, n_labels=3.
    N, C_in, H, W = 2, 4, 16, 16
    n_labels = 3

    key = jax.random.PRNGKey(0)
    kx, kw, kb = jax.random.split(key, 3)

    x = jax.random.normal(kx, (N, C_in, H, W), dtype=jnp.float32)
    weight = jax.random.normal(kw, (n_labels, C_in, 1, 1), dtype=jnp.float32) * 0.1
    bias = jax.random.normal(kb, (n_labels,), dtype=jnp.float32) * 0.1

    # Plain-JAX reference (Conv2d 1x1 + Sigmoid).
    ref = jax.nn.sigmoid(
        jnp.einsum("nchw,oc->nohw", x, weight.reshape(n_labels, C_in))
        + bias[None, :, None, None]
    )

    # Exact-reciprocal sigmoid path: matches the reference to f32 precision.
    out_exact = jax.block_until_ready(
        output_transition(x, weight, bias, approx_sigmoid=False))
    assert out_exact.shape == (N, n_labels, H, W)
    assert jnp.allclose(out_exact, ref, atol=1e-5), "exact-path mismatch"

    # Default fast path: EUP approximate reciprocal inside the sigmoid.
    out_fast = jax.block_until_ready(output_transition(x, weight, bias))
    assert out_fast.shape == (N, n_labels, H, W)
    assert jnp.allclose(out_fast, ref, atol=2e-3), "approx-path mismatch"

    print("KERNEL_OK")
</pallas_src>

<mosaic_0001>
module attributes {stable_mosaic.version = 11 : i64} {
  func.func @_output_transition_kernel(%arg0: i32, %arg1: i32, %arg2: memref<3x4xf32, #tpu.memory_space<smem>>, %arg3: memref<3xf32, #tpu.memory_space<smem>>, %arg4: memref<1x4x2x128xf32, #tpu.memory_space<vmem>>, %arg5: memref<1x3x2x128xf32, #tpu.memory_space<vmem>>) attributes {dimension_semantics = [#tpu.dimension_semantics<parallel>, #tpu.dimension_semantics<parallel>], iteration_bounds = array<i64: 2, 1>, scalar_prefetch = 0 : i64, scratch_operands = 0 : i64, tpu.core_type = #tpu.core_type<tc>, window_params = [{transform_indices = @transform_0, window_bounds = array<i64: 3, 4>}, {transform_indices = @transform_1, window_bounds = array<i64: 3>}, {transform_indices = @transform_2, window_bounds = array<i64: 1, 4, 2, 128>}, {transform_indices = @transform_3, window_bounds = array<i64: 1, 3, 2, 128>}]} {
    %c0 = arith.constant 0 : index
    %c0_0 = arith.constant 0 : index
    %c0_1 = arith.constant 0 : index
    %c0_2 = arith.constant 0 : index
    %0 = vector.load %arg4[%c0, %c0_0, %c0_1, %c0_2] : memref<1x4x2x128xf32, #tpu.memory_space<vmem>>, vector<1x4x2x128xf32>
    %1 = vector.shape_cast %0 : vector<1x4x2x128xf32> to vector<4x2x128xf32>
    %c0_3 = arith.constant 0 : index
    %c0_4 = arith.constant 0 : index
    %2 = memref.load %arg2[%c0_3, %c0_4] : memref<3x4xf32, #tpu.memory_space<smem>>
    %3 = vector.extract_strided_slice %1 {offsets = [0, 0, 0], sizes = [1, 2, 128], strides = [1, 1, 1]} : vector<4x2x128xf32> to vector<1x2x128xf32>
    %4 = vector.shape_cast %3 : vector<1x2x128xf32> to vector<2x128xf32>
    %5 = vector.broadcast %2 : f32 to vector<2x128xf32>
    %6 = arith.mulf %5, %4 : vector<2x128xf32>
    %c0_5 = arith.constant 0 : index
    %c1 = arith.constant 1 : index
    %7 = memref.load %arg2[%c0_5, %c1] : memref<3x4xf32, #tpu.memory_space<smem>>
    %8 = vector.extract_strided_slice %1 {offsets = [1, 0, 0], sizes = [1, 2, 128], strides = [1, 1, 1]} : vector<4x2x128xf32> to vector<1x2x128xf32>
    %9 = vector.shape_cast %8 : vector<1x2x128xf32> to vector<2x128xf32>
    %10 = vector.broadcast %7 : f32 to vector<2x128xf32>
    %11 = arith.mulf %10, %9 : vector<2x128xf32>
    %12 = arith.addf %6, %11 : vector<2x128xf32>
    %c0_6 = arith.constant 0 : index
    %c2 = arith.constant 2 : index
    %13 = memref.load %arg2[%c0_6, %c2] : memref<3x4xf32, #tpu.memory_space<smem>>
    %14 = vector.extract_strided_slice %1 {offsets = [2, 0, 0], sizes = [1, 2, 128], strides = [1, 1, 1]} : vector<4x2x128xf32> to vector<1x2x128xf32>
    %15 = vector.shape_cast %14 : vector<1x2x128xf32> to vector<2x128xf32>
    %16 = vector.broadcast %13 : f32 to vector<2x128xf32>
    %17 = arith.mulf %16, %15 : vector<2x128xf32>
    %18 = arith.addf %12, %17 : vector<2x128xf32>
    %c0_7 = arith.constant 0 : index
    %c3 = arith.constant 3 : index
    %19 = memref.load %arg2[%c0_7, %c3] : memref<3x4xf32, #tpu.memory_space<smem>>
    %20 = vector.extract_strided_slice %1 {offsets = [3, 0, 0], sizes = [1, 2, 128], strides = [1, 1, 1]} : vector<4x2x128xf32> to vector<1x2x128xf32>
    %21 = vector.shape_cast %20 : vector<1x2x128xf32> to vector<2x128xf32>
    %22 = vector.broadcast %19 : f32 to vector<2x128xf32>
    %23 = arith.mulf %22, %21 : vector<2x128xf32>
    %24 = arith.addf %18, %23 : vector<2x128xf32>
    %c0_8 = arith.constant 0 : index
    %25 = memref.load %arg3[%c0_8] : memref<3xf32, #tpu.memory_space<smem>>
    %26 = vector.broadcast %25 : f32 to vector<2x128xf32>
    %27 = arith.addf %24, %26 : vector<2x128xf32>
    %cst = arith.constant 0.000000e+00 : f32
    %28 = vector.broadcast %cst : f32 to vector<2x128xf32>
    %29 = arith.subf %28, %27 : vector<2x128xf32>
    %30 = math.exp %29 : vector<2x128xf32>
    %cst_9 = arith.constant 1.000000e+00 : f32
    %31 = vector.broadcast %cst_9 : f32 to vector<2x128xf32>
    %32 = arith.addf %31, %30 : vector<2x128xf32>
    %33 = tpu.reciprocal %32 : vector<2x128xf32> -> vector<2x128xf32>
    %c0_10 = arith.constant 0 : index
    %c0_11 = arith.constant 0 : index
    %c0_12 = arith.constant 0 : index
    %c0_13 = arith.constant 0 : index
    %34 = vector.load %arg5[%c0_10, %c0_11, %c0_12, %c0_13] : memref<1x3x2x128xf32, #tpu.memory_space<vmem>>, vector<1x1x2x128xf32>
    %35 = vector.shape_cast %34 : vector<1x1x2x128xf32> to vector<2x128xf32>
    %36 = vector.shape_cast %33 : vector<2x128xf32> to vector<1x1x2x128xf32>
    tpu.vector_store %arg5[%c0_10, %c0_11, %c0_12, %c0_13], %36 {strides = array<i32>} : memref<1x3x2x128xf32, #tpu.memory_space<vmem>>, vector<1x1x2x128xf32>,
    %c1_14 = arith.constant 1 : index
    %c0_15 = arith.constant 0 : index
    %37 = memref.load %arg2[%c1_14, %c0_15] : memref<3x4xf32, #tpu.memory_space<smem>>
    %38 = vector.extract_strided_slice %1 {offsets = [0, 0, 0], sizes = [1, 2, 128], strides = [1, 1, 1]} : vector<4x2x128xf32> to vector<1x2x128xf32>
    %39 = vector.shape_cast %38 : vector<1x2x128xf32> to vector<2x128xf32>
    %40 = vector.broadcast %37 : f32 to vector<2x128xf32>
    %41 = arith.mulf %40, %39 : vector<2x128xf32>
    %c1_16 = arith.constant 1 : index
    %c1_17 = arith.constant 1 : index
    %42 = memref.load %arg2[%c1_16, %c1_17] : memref<3x4xf32, #tpu.memory_space<smem>>
    %43 = vector.extract_strided_slice %1 {offsets = [1, 0, 0], sizes = [1, 2, 128], strides = [1, 1, 1]} : vector<4x2x128xf32> to vector<1x2x128xf32>
    %44 = vector.shape_cast %43 : vector<1x2x128xf32> to vector<2x128xf32>
    %45 = vector.broadcast %42 : f32 to vector<2x128xf32>
    %46 = arith.mulf %45, %44 : vector<2x128xf32>
    %47 = arith.addf %41, %46 : vector<2x128xf32>
    %c1_18 = arith.constant 1 : index
    %c2_19 = arith.constant 2 : index
    %48 = memref.load %arg2[%c1_18, %c2_19] : memref<3x4xf32, #tpu.memory_space<smem>>
    %49 = vector.extract_strided_slice %1 {offsets = [2, 0, 0], sizes = [1, 2, 128], strides = [1, 1, 1]} : vector<4x2x128xf32> to vector<1x2x128xf32>
    %50 = vector.shape_cast %49 : vector<1x2x128xf32> to vector<2x128xf32>
    %51 = vector.broadcast %48 : f32 to vector<2x128xf32>
    %52 = arith.mulf %51, %50 : vector<2x128xf32>
    %53 = arith.addf %47, %52 : vector<2x128xf32>
    %c1_20 = arith.constant 1 : index
    %c3_21 = arith.constant 3 : index
    %54 = memref.load %arg2[%c1_20, %c3_21] : memref<3x4xf32, #tpu.memory_space<smem>>
    %55 = vector.extract_strided_slice %1 {offsets = [3, 0, 0], sizes = [1, 2, 128], strides = [1, 1, 1]} : vector<4x2x128xf32> to vector<1x2x128xf32>
    %56 = vector.shape_cast %55 : vector<1x2x128xf32> to vector<2x128xf32>
    %57 = vector.broadcast %54 : f32 to vector<2x128xf32>
    %58 = arith.mulf %57, %56 : vector<2x128xf32>
    %59 = arith.addf %53, %58 : vector<2x128xf32>
    %c1_22 = arith.constant 1 : index
    %60 = memref.load %arg3[%c1_22] : memref<3xf32, #tpu.memory_space<smem>>
    %61 = vector.broadcast %60 : f32 to vector<2x128xf32>
    %62 = arith.addf %59, %61 : vector<2x128xf32>
    %cst_23 = arith.constant 0.000000e+00 : f32
    %63 = vector.broadcast %cst_23 : f32 to vector<2x128xf32>
    %64 = arith.subf %63, %62 : vector<2x128xf32>
    %65 = math.exp %64 : vector<2x128xf32>
    %cst_24 = arith.constant 1.000000e+00 : f32
    %66 = vector.broadcast %cst_24 : f32 to vector<2x128xf32>
    %67 = arith.addf %66, %65 : vector<2x128xf32>
    %68 = tpu.reciprocal %67 : vector<2x128xf32> -> vector<2x128xf32>
    %c0_25 = arith.constant 0 : index
    %c1_26 = arith.constant 1 : index
    %c0_27 = arith.constant 0 : index
    %c0_28 = arith.constant 0 : index
    %69 = vector.load %arg5[%c0_25, %c1_26, %c0_27, %c0_28] : memref<1x3x2x128xf32, #tpu.memory_space<vmem>>, vector<1x1x2x128xf32>
    %70 = vector.shape_cast %69 : vector<1x1x2x128xf32> to vector<2x128xf32>
    %71 = vector.shape_cast %68 : vector<2x128xf32> to vector<1x1x2x128xf32>
    tpu.vector_store %arg5[%c0_25, %c1_26, %c0_27, %c0_28], %71 {strides = array<i32>} : memref<1x3x2x128xf32, #tpu.memory_space<vmem>>, vector<1x1x2x128xf32>,
    %c2_29 = arith.constant 2 : index
    %c0_30 = arith.constant 0 : index
    %72 = memref.load %arg2[%c2_29, %c0_30] : memref<3x4xf32, #tpu.memory_space<smem>>
    %73 = vector.extract_strided_slice %1 {offsets = [0, 0, 0], sizes = [1, 2, 128], strides = [1, 1, 1]} : vector<4x2x128xf32> to vector<1x2x128xf32>
    %74 = vector.shape_cast %73 : vector<1x2x128xf32> to vector<2x128xf32>
    %75 = vector.broadcast %72 : f32 to vector<2x128xf32>
    %76 = arith.mulf %75, %74 : vector<2x128xf32>
    %c2_31 = arith.constant 2 : index
    %c1_32 = arith.constant 1 : index
    %77 = memref.load %arg2[%c2_31, %c1_32] : memref<3x4xf32, #tpu.memory_space<smem>>
    %78 = vector.extract_strided_slice %1 {offsets = [1, 0, 0], sizes = [1, 2, 128], strides = [1, 1, 1]} : vector<4x2x128xf32> to vector<1x2x128xf32>
    %79 = vector.shape_cast %78 : vector<1x2x128xf32> to vector<2x128xf32>
    %80 = vector.broadcast %77 : f32 to vector<2x128xf32>
    %81 = arith.mulf %80, %79 : vector<2x128xf32>
    %82 = arith.addf %76, %81 : vector<2x128xf32>
    %c2_33 = arith.constant 2 : index
    %c2_34 = arith.constant 2 : index
    %83 = memref.load %arg2[%c2_33, %c2_34] : memref<3x4xf32, #tpu.memory_space<smem>>
    %84 = vector.extract_strided_slice %1 {offsets = [2, 0, 0], sizes = [1, 2, 128], strides = [1, 1, 1]} : vector<4x2x128xf32> to vector<1x2x128xf32>
    %85 = vector.shape_cast %84 : vector<1x2x128xf32> to vector<2x128xf32>
    %86 = vector.broadcast %83 : f32 to vector<2x128xf32>
    %87 = arith.mulf %86, %85 : vector<2x128xf32>
    %88 = arith.addf %82, %87 : vector<2x128xf32>
    %c2_35 = arith.constant 2 : index
    %c3_36 = arith.constant 3 : index
    %89 = memref.load %arg2[%c2_35, %c3_36] : memref<3x4xf32, #tpu.memory_space<smem>>
    %90 = vector.extract_strided_slice %1 {offsets = [3, 0, 0], sizes = [1, 2, 128], strides = [1, 1, 1]} : vector<4x2x128xf32> to vector<1x2x128xf32>
    %91 = vector.shape_cast %90 : vector<1x2x128xf32> to vector<2x128xf32>
    %92 = vector.broadcast %89 : f32 to vector<2x128xf32>
    %93 = arith.mulf %92, %91 : vector<2x128xf32>
    %94 = arith.addf %88, %93 : vector<2x128xf32>
    %c2_37 = arith.constant 2 : index
    %95 = memref.load %arg3[%c2_37] : memref<3xf32, #tpu.memory_space<smem>>
    %96 = vector.broadcast %95 : f32 to vector<2x128xf32>
    %97 = arith.addf %94, %96 : vector<2x128xf32>
    %cst_38 = arith.constant 0.000000e+00 : f32
    %98 = vector.broadcast %cst_38 : f32 to vector<2x128xf32>
    %99 = arith.subf %98, %97 : vector<2x128xf32>
    %100 = math.exp %99 : vector<2x128xf32>
    %cst_39 = arith.constant 1.000000e+00 : f32
    %101 = vector.broadcast %cst_39 : f32 to vector<2x128xf32>
    %102 = arith.addf %101, %100 : vector<2x128xf32>
    %103 = tpu.reciprocal %102 : vector<2x128xf32> -> vector<2x128xf32>
    %c0_40 = arith.constant 0 : index
    %c2_41 = arith.constant 2 : index
    %c0_42 = arith.constant 0 : index
    %c0_43 = arith.constant 0 : index
    %104 = vector.load %arg5[%c0_40, %c2_41, %c0_42, %c0_43] : memref<1x3x2x128xf32, #tpu.memory_space<vmem>>, vector<1x1x2x128xf32>
    %105 = vector.shape_cast %104 : vector<1x1x2x128xf32> to vector<2x128xf32>
    %106 = vector.shape_cast %103 : vector<2x128xf32> to vector<1x1x2x128xf32>
    tpu.vector_store %arg5[%c0_40, %c2_41, %c0_42, %c0_43], %106 {strides = array<i32>} : memref<1x3x2x128xf32, #tpu.memory_space<vmem>>, vector<1x1x2x128xf32>,
    return
  }
  func.func @transform_0(%arg0: i32, %arg1: i32) -> (i32, i32) {
    %c0_i32 = arith.constant 0 : i32
    %c0_i32_0 = arith.constant 0 : i32
    %c0_i32_1 = arith.constant 0 : i32
    return %c0_i32, %c0_i32_0 : i32, i32
  }
  func.func @transform_1(%arg0: i32, %arg1: i32) -> i32 {
    %c0_i32 = arith.constant 0 : i32
    %c0_i32_0 = arith.constant 0 : i32
    return %c0_i32 : i32
  }
  func.func @transform_2(%arg0: i32, %arg1: i32) -> (i32, i32, i32, i32) {
    %c0_i32 = arith.constant 0 : i32
    %c0_i32_0 = arith.constant 0 : i32
    %c0_i32_1 = arith.constant 0 : i32
    return %arg0, %c0_i32, %arg1, %c0_i32_0 : i32, i32, i32, i32
  }
  func.func @transform_3(%arg0: i32, %arg1: i32) -> (i32, i32, i32, i32) {
    %c0_i32 = arith.constant 0 : i32
    %c0_i32_0 = arith.constant 0 : i32
    %c0_i32_1 = arith.constant 0 : i32
    return %arg0, %c0_i32, %arg1, %c0_i32_0 : i32, i32, i32, i32
  }
}

</mosaic_0001>

<bundles_post_ra>
// kernel: tpu_custom_call.1
= control target key start
LH: loop header
LB: loop body
LE: loop exit
PB: predicated region body
PF: predicated region fallthrough
CT: control target
= control target key end

     0   :  { %8 = vsyncpa [#allocation5], 0  ;;  %s973_s0 = inlined_call_operand.hbm [shape: f32[3,4], index: 0, kind: input, shape index: {}]   ;;  %s974_s1 = inlined_call_operand.vmem [shape: f32[3], index: 1, kind: input, shape index: {}]   ;;  %s975_s2 = inlined_call_operand.hbm [shape: f32[2,4,2,128], index: 2, kind: input, shape index: {}]   ;;  %s976_s3 = inlined_call_operand.hbm [shape: f32[2,3,2,128], index: 3, kind: output, shape index: {}]  }
   0x1   :  { %9 = vsyncpa [#allocation6], 0 }
   0x2   :  { %10 = vsyncpa [#allocation3], 0 }
   0x3   :  { %12 = vsyncpa [#allocation3 + $0x1], 0 }
   0x4   :  { %13 = vsyncpa [#allocation4], 0 }
   0x5   :  { %15 = vsyncpa [#allocation4 + $0x1], 0  ;;  %s744_s12 = smov 0   ;;  %s746_s13 = smov 0  }
   0x6   :  { %s748_s14 = smov 0   ;;  %s750_s15 = smov 0  }
   0x7   :  { %s752_s16 = smov 0   ;;  %s754_s17 = smov 0  }
   0x8 LB: > { %s433_s18 = sadd.s32 4294967295, %s714_s17   ;;  %s434_s19 = sadd.s32 4294967294, %s714_s17   ;;  %s714_s17 = sphi %s754_s17, %s21_s17   ;;  %s710_s16 = sphi %s752_s16, %s997_s16   ;;  %s706_s15 = sphi %s750_s15, %s996_s15   ;;  %s702_s14 = sphi %s748_s14, %s995_s14   ;;  %s698_s13 = sphi %s746_s13, %s994_s13   ;;  %s694_s12 = sphi %s744_s12, %s993_s12  }
   0x9   : > { %s84_s20 = sadd.s32 1, %s702_s14  ;;  %p91_p0 = scmp.ne.s32.totalorder %s702_s14, %s698_s13 }
   0xa   : > { %p92_p1 = scmp.eq.s32.totalorder %s714_s17, 0  ;;  %p97_p2 = scmp.ne.s32.totalorder %s698_s13, %s694_s12 }
   0xb   : > { %p782_p3 = scmp.eq.s32.totalorder %s433_s18, 0  ;;  %p123_p4 = scmp.eq.s32.totalorder %s433_s18, 1 }
   0xc   : > { %p93_p5 = por %p92_p1, %p91_p0  ;;  %p129_p6 = scmp.eq.s32.totalorder %s434_s19, 1 }
   0xd   : > { %s981_s21 = scalar_select %p782_p3, 1, 0 }
   0xe   : > { %p788_p7 = por %p782_p3, %p97_p2  ;;  %p792_p8 = por %p123_p4, %p91_p0 }
   0xf   : > { %p796_p9 = por %p129_p6, %p97_p2  ;;  %p435_p10 = scmp.ge.s32.totalorder %s714_s17, 1 }
  0x10   : > { %s982_s22 = scalar_select %p788_p7, 1, 0 }
  0x11   : > { %s983_s23 = scalar_select %p792_p8, 1, 0 }
  0x12   : > { %s984_s24 = scalar_select %p796_p9, 1, 0 }
  0x13   : > { %p136_p11 = scmp.lt.s32.totalorder %s714_s17, 3  ;;  %p496_p1 = scmp.lt.s32.totalorder %s714_s17, 2 }
  0x14   : > { %s158_s28 = sshll.u32 %s974_s1, 4  ;;  %s169_s4 = sand.u32 1, %s702_s14   ;;  %s159_s28 = int_to_ptr.vmem [resolvable:$true] %s158_s28 }
  0x15   : > { %p803_p13 = pnand %p435_p10, %p136_p11  ;;  %p813_p4 = pnand %p496_p1, %p93_p5 }
  0x16   : > { %s33_s5 = sadd.s32 1, %s710_s16  ;;  %s566_s8 = scalar_lea.hbm %s973_s0, 64 }
  0x17   : > { %p479_p0 = pneg %p803_p13  ;;  %p567_p5 = scmp.ne.s32.totalorder %s973_s0, %s566_s8 }
  0x18   : > { %p573_p1 = scmp.lt.u32.totalorder %s566_s8, %s973_s0 }
  0x19   : > { %p819_p2 = pnand %p479_p0, %p782_p3 }
  0x1b   : > { %p568_p6 = pneg %p819_p2 }
  0x1d   : > { %p569_p10 = pnand %p568_p6, %p567_p5 }
  0x1f   : > { %p570_p11 = pneg %p569_p10 }
  0x21   : > { %p575_p0 = pnand %p573_p1, %p570_p11 }
  0x23   : > { %578 = shalt.err (!%p575_p0)
}
  0x24   : > { %s716_s19 = smov [#allocation2]   ;;  %s579_s6 = scalar_lea.vmem %s159_s28, 16 }
  0x25   : > { %482 = dma.hbm_to_smem (!%p819_p2), %s973_s0, 64, %s716_s19, [#allocation5]  }
  0x26   : > { %p580_p12 = scmp.ne.s32.totalorder %s159_s28, %s579_s6  ;;  %p587_p7 = scmp.lt.s32.totalorder %s159_s28, %s159_s28 }
  0x27   : > { %p588_p5 = scmp.lt.s32.totalorder %s579_s6, %s579_s6 }
  0x28   : > { %p582_p9 = pnand %p580_p12, %p568_p6 }
  0x29   : > { %p589_p10 = por %p588_p5, %p587_p7 }
  0x2a   : > { %p583_p8 = pneg %p582_p9 }
  0x2c   : > { %p590_p3 = pnand %p589_p10, %p583_p8 }
  0x2e   : > { %593 = shalt.err (!%p590_p3)
}
  0x2f   : > { %s717_s7 = smov [#allocation7]   ;;  %p35_p11 = scmp.ge.s32.totalorder %s33_s5, 2 }
  0x30   : > { %485 = dma.vmem_to_smem (!%p819_p2), %s159_s28, 16, %s717_s7, [#allocation6]  }
  0x31   : > { %s439_s8 = sshll.u32 %s169_s4, 3  ;;  %s464_s9 = sshll.u32 %s710_s16, 7 }
  0x32   : > { %s999_s5 = smov (%p35_p11, %s33_s5), 0  ;;  %s851_s30 = scalar_lea.hbm %s975_s2, %s464_s9 }
  0x33   : > { %s79_s18 = ssub.s32 %s710_s16, %s999_s5  ;;  %s173_s19 = scalar_lea.vmem [#allocation8], %s439_s8 }
  0x34   : > { %s181_s28 = sshll.u32 %s173_s19, 4  ;;  %p82_p3 = scmp.eq.s32.totalorder %s79_s18, 0  ;;  %s855_s28 = int_to_ptr.vmem [resolvable:$true] %s181_s28 }
  0x35   : > { %s864_s27 = scalar_lea.sflag [#allocation3], %s169_s4  ;;  %s594_s6 = scalar_lea.hbm %s851_s30, 128 }
  0x36   : > { %s860_s26 = scalar_select %p82_p3, %s702_s14, %s84_s20  }
  0x37   : > { %p595_p7 = scmp.ne.s32.totalorder %s851_s30, %s594_s6  ;;  %p596_p8 = pneg %p813_p4 }
  0x38   : > { %s599_s9 = scalar_lea.hbm %s975_s2, 256  ;;  %p600_p2 = scmp.lt.u32.totalorder %s851_s30, %s975_s2 }
  0x39   : > { %p597_p9 = pnand %p596_p8, %p595_p7  ;;  %p601_p6 = scmp.lt.u32.totalorder %s599_s9, %s594_s6 }
  0x3a   : > { %p603_p0 = scmp.lt.u32.totalorder %s594_s6, %s851_s30 }
  0x3b   : > { %p598_p12 = pneg %p597_p9  ;;  %p602_p1 = por %p601_p6, %p600_p2 }
  0x3d   : > { %p604_p5 = por %p603_p0, %p602_p1 }
  0x3f   : > { %p605_p10 = pnand %p604_p5, %p598_p12 }
  0x41   : > { %608 = shalt.err (!%p605_p10)
}
  0x42   : > { %s609_s20 = scalar_lea.vmem %s855_s28, 128  ;;  %s718_s4 = smov [#allocation8]  }
  0x43   : > { %p610_p11 = scmp.ne.s32.totalorder %s855_s28, %s609_s20  ;;  %s614_s18 = sshll.u32 %s718_s4, 4  ;;  %s615_s18 = int_to_ptr.vmem [resolvable:$false] %s614_s18 }
  0x44   : > { %s616_s19 = scalar_lea.vmem %s615_s18, 256  ;;  %p617_p9 = scmp.lt.s32.totalorder %s855_s28, %s615_s18 }
  0x45   : > { %p612_p3 = pnand %p610_p11, %p596_p8  ;;  %p618_p2 = scmp.lt.s32.totalorder %s616_s19, %s609_s20 }
  0x47   : > { %p613_p7 = pneg %p612_p3  ;;  %p619_p6 = por %p618_p2, %p617_p9 }
  0x49   : > { %p620_p1 = pnand %p619_p6, %p613_p7 }
  0x4b   : > { %623 = shalt.err (!%p620_p1)
}
  0x4c   : > { %s719_s6 = smov 32   ;;  %s720_s7 = smov 2  }
  0x4d   : > { %489 = dma.hbm_to_vmem [thread:$0]  (!%p813_p4), %s851_s30, 128, %s855_s28, %s864_s27, %s719_s6, %s719_s6, %s720_s7  }
  0x4e   : > { %193 = sbr.rel (%p803_p13) target bundleno = 159 (0x9f), region = 32  ;;  %p988_p8 = scmp.ne.s32.totalorder (!%p803_p13), %s981_s21, 0 }
  0x55   : > { %677 = dma.done.wait (%p988_p8), [#allocation5], 64  }
  0x56   : > { %679 = vsyncadd (%p988_p8), [#allocation5], 4294967232 }
  0x57   : > { %681 = dma.done.wait (%p988_p8), [#allocation6], 16  }
  0x58   : > { %683 = vsyncadd (%p988_p8), [#allocation6], 4294967280  ;;  %s903_s8 = sand.u32 1, %s698_s13   ;;  %p989_p13 = scmp.ne.s32.totalorder %s982_s22, 0 }
  0x59   : > { %s445_s25 = sshll.u32 %s903_s8, 3  ;;  %s204_s29 = scalar_lea.sflag [#allocation3], %s903_s8 }
  0x5a   : > { %s207_s30 = scalar_lea.vmem [#allocation8], %s445_s25 }
  0x5b   : > { %685 = dma.done.wait (%p989_p13), %s204_s29, 128  }
  0x5c   : > { %687 = vsyncadd (%p989_p13), %s204_s29, 4294967168 }
  0x5d   : > { %212 = sfence }
  0x5e   : > { %s235_s28 = sld [smem:[#allocation2]]  ;;  %s446_s27 = sld [smem:[#allocation2 + $0x1]]  ;;  %v231_v0 = vld [vmem:[%s207_s30] sm:$0x3]  ;;  %v232_v1 = vld [vmem:[%s207_s30 + $0x2] sm:$0x3] }
  0x5f   : > { %s447_s9 = sld [smem:[#allocation2 + $0x2]]  ;;  %s448_s21 = sld [smem:[#allocation2 + $0x3]]  ;;  %v233_v2 = vld [vmem:[%s207_s30 + $0x4] sm:$0x3]  ;;  %v234_v4 = vld [vmem:[%s207_s30 + $0x6] sm:$0x3] }
  0x60   : > { %s911_s10 = sld [smem:[#allocation7]]  ;;  %s450_s20 = sld [smem:[#allocation2 + $0x81]] }
  0x61   : > { %s449_s11 = sld [smem:[#allocation2 + $0x80]]  ;;  %s451_s4 = sld [smem:[#allocation2 + $0x82]] }
  0x62   : > { %s452_s18 = sld [smem:[#allocation2 + $0x83]]  ;;  %s455_s22 = sld [smem:[#allocation2 + $0x100]] }
  0x63   : > { %s456_s19 = sld [smem:[#allocation2 + $0x101]]  ;;  %s457_s6 = sld [smem:[#allocation2 + $0x102]] }
  0x64   : > { %v236_v3 = vstv %s235_s28  ;;  %v239_v6 = vstv %s446_s27  ;;  %s458_s7 = sld [smem:[#allocation2 + $0x103]]  ;;  %s913_s25 = sld [smem:[#allocation7 + $0x1]] }
  0x65   : > { %v237_v5 = vmul.f32 %v236_v3, %v231_v0  ;;  %v240_v7 = vmul.f32 %v239_v6, %v232_v1  ;;  %v243_v8 = vstv %s447_s9  ;;  %v247_v9 = vstv %s448_s21  ;;  %s459_s29 = sld [smem:[#allocation7 + $0x2]]  ;;  %s465_s30 = smul.u32 6, %s903_s8 }
  0x66   : > { %v244_v10 = vmul.f32 %v243_v8, %v233_v2  ;;  %v248_v12 = vmul.f32 %v247_v9, %v234_v4  ;;  %v263_v15 = vstv %s450_s20  ;;  %v251_v21 = vstv %s911_s10  ;;  %s466_s9 = smul.u32 96, %s706_s15  ;;  %s310_s20 = scalar_lea.sflag [#allocation4], %s903_s8 }
  0x67   : > { %v241_v11 = vadd.f32 %v240_v7, %v237_v5  ;;  %v260_v13 = vstv %s449_s11  ;;  %v267_v16 = vstv %s451_s4  ;;  %v264_v18 = vmul.f32 %v263_v15, %v232_v1  ;;  %s230_s28 = scalar_lea.vmem [#allocation9], %s465_s30  ;;  %p990_p12 = scmp.ne.s32.totalorder %s983_s23, 0 }
  0x68   : > { %v261_v14 = vmul.f32 %v260_v13, %v231_v0  ;;  %v268_v19 = vmul.f32 %v267_v16, %v233_v2  ;;  %v271_v20 = vstv %s452_s18  ;;  %v285_v23 = vstv %s455_s22  ;;  %s324_s27 = sshll.u32 %s230_s28, 4  ;;  %s924_s11 = scalar_lea.hbm %s976_s3, %s466_s9  ;;  %s919_s27 = int_to_ptr.vmem [resolvable:$true] %s324_s27 }
  0x69   : > { %v245_v17 = vadd.f32 %v244_v10, %v241_v11  ;;  %v272_v22 = vmul.f32 %v271_v20, %v234_v4  ;;  %v288_v24 = vstv %s456_s19  ;;  %v286_v27 = vmul.f32 %v285_v23, %v231_v0  ;;  %s624_s4 = scalar_lea.vmem %s919_s27, 96  ;;  %s721_s15 = smov [#allocation9]  }
  0x6a   : > { %v265_v26 = vadd.f32 %v264_v18, %v261_v14  ;;  %v289_v28 = vmul.f32 %v288_v24, %v232_v1  ;;  %v292_v29 = vstv %s457_s6  ;;  %v296_v30 = vstv %s458_s7  ;;  %p625_p4 = scmp.ne.s32.totalorder %s919_s27, %s624_s4  ;;  %s628_s18 = sshll.u32 %s721_s15, 4  ;;  %s629_s18 = int_to_ptr.vmem [resolvable:$false] %s628_s18 }
  0x6b   : > { %v249_v25 = vadd.f32 %v248_v12, %v245_v17  ;;  %v293_v34 = vmul.f32 %v292_v29, %v233_v2  ;;  %v275_v35 = vstv %s913_s25  ;;  %v297_v36 = vmul.f32 %v296_v30, %v234_v4  ;;  %s630_s22 = scalar_lea.vmem %s629_s18, 192  ;;  %p631_p10 = scmp.lt.s32.totalorder %s919_s27, %s629_s18 }
  0x6c   : > { %v269_v32 = vadd.f32 %v268_v19, %v265_v26  ;;  %v290_v33 = vadd.f32 %v289_v28, %v286_v27  ;;  %v300_v40 = vstv %s459_s29  ;;  %p626_p0 = pnand %p625_p4, %p990_p12  ;;  %p632_p11 = scmp.lt.s32.totalorder %s630_s22, %s624_s4 }
  0x6d   : > { %v252_v31 = vadd.f32 %v251_v21, %v249_v25 }
  0x6e   : > { %v273_v38 = vadd.f32 %v272_v22, %v269_v32  ;;  %v294_v39 = vadd.f32 %v293_v34, %v290_v33  ;;  %p627_p5 = pneg %p626_p0  ;;  %p633_p3 = por %p632_p11, %p631_p10 }
  0x6f   : > { %v253_v37 = vsub.f32 0.0, %v252_v31 }
  0x70   : > { %v276_v42 = vadd.f32 %v275_v35, %v273_v38  ;;  %v298_v43 = vadd.f32 %v297_v36, %v294_v39  ;;  %p634_p7 = pnand %p633_p3, %p627_p5 }
  0x71   : > { %v254_v41 = vmul.f32 1.442695, %v253_v37 }
  0x72   : > { %v277_v44 = vsub.f32 0.0, %v276_v42  ;;  %v301_v45 = vadd.f32 %v300_v40, %v298_v43 }
  0x73   : > { %554 = vpow2.f32 %v254_v41 }
  0x74   : > { %v278_v46 = vmul.f32 1.442695, %v277_v44  ;;  %v302_v47 = vsub.f32 0.0, %v301_v45 }
  0x76   : > { %556 = vpow2.f32 %v278_v46  ;;  %v303_v48 = vmul.f32 1.442695, %v302_v47 }
  0x78   : > { %558 = vpow2.f32 %v303_v48 }
  0x7d   : > { %v555_v49 = vpop.eup %554 }
  0x7e   : > { %v256_v50 = vadd.f32 1.0, %v555_v49 }
  0x80   : > { %560 = vrcp.f32 %v256_v50  ;;  %v557_v51 = vpop.eup %556 }
  0x81   : > { %v280_v52 = vadd.f32 1.0, %v557_v51 }
  0x82   : > { %v559_v53 = vpop.eup %558 }
  0x83   : > { %562 = vrcp.f32 %v280_v52  ;;  %v305_v54 = vadd.f32 1.0, %v559_v53 }
  0x85   : > { %564 = vrcp.f32 %v305_v54 }
  0x8a   : > { %v561_v55 = vpop.eup %560 }
  0x8b   : > { %258 = vst [vmem:[%s230_s28] sm:$0x3] %v561_v55 }
  0x8d   : > { %v563_v56 = vpop.eup %562 }
  0x8e   : > { %454 = vst [vmem:[%s230_s28 + $0x2] sm:$0x3] %v563_v56 }
  0x8f   : > { %v565_v57 = vpop.eup %564 }
  0x90   : > { %460 = vst [vmem:[%s230_s28 + $0x4] sm:$0x3] %v565_v57 }
  0x91   : > { %637 = shalt.err (!%p634_p7)
}
  0x92   : > { %s638_s19 = scalar_lea.hbm %s924_s11, 96  ;;  %s642_s25 = scalar_lea.hbm %s976_s3, 192 }
  0x93   : > { %p639_p9 = scmp.ne.s32.totalorder %s924_s11, %s638_s19  ;;  %p643_p1 = scmp.lt.u32.totalorder %s924_s11, %s976_s3 }
  0x94   : > { %p644_p8 = scmp.lt.u32.totalorder %s642_s25, %s638_s19  ;;  %p646_p4 = scmp.lt.u32.totalorder %s638_s19, %s924_s11 }
  0x95   : > { %p640_p2 = pnand %p639_p9, %p990_p12 }
  0x96   : > { %p645_p13 = por %p644_p8, %p643_p1 }
  0x97   : > { %p641_p6 = pneg %p640_p2 }
  0x98   : > { %p647_p0 = por %p646_p4, %p645_p13 }
  0x9a   : > { %p648_p5 = pnand %p647_p0, %p641_p6 }
  0x9c   : > { %651 = shalt.err (!%p648_p5)
}
  0x9d   : > { %s722_s28 = smov 32   ;;  %s723_s9 = smov 2  }
  0x9e   : > { %477 = dma.vmem_to_hbm [thread:$0]  (%p990_p12), %s919_s27, 96, %s924_s11, %s310_s20, %s722_s28, %s722_s28, %s723_s9  }
  0x9f PF: > { %s339_s21 = sand.u32 1, %s694_s12   ;;  %p991_p10 = scmp.ne.s32.totalorder %s984_s24, 0 }
  0xa0   : > { %p992_p11 = scmp.ge.s32.totalorder %s714_s17, 2  ;;  %s340_s10 = scalar_lea.sflag [#allocation4], %s339_s21 }
  0xa2   : > { %p491_p3 = pnand %p992_p11, %p991_p10 }
  0xa4   : > { %689 = dma.done.wait (!%p491_p3), %s340_s10, 96  }
  0xa5   : > { %691 = vsyncadd (!%p491_p3), %s340_s10, 4294967200  ;;  %s21_s17 = sadd.s32 1, %s714_s17   ;;  %s993_s12 = smov %s698_s13 }
  0xa6   : > { %p18_p7 = scmp.ge.s32.totalorder %s21_s17, 4   ;;  %s994_s13 = smov %s702_s14 }
  0xa7   : > { %s995_s14 = smov %s860_s26  ;;  %s996_s15 = smov %s710_s16 }
  0xa8   : > { %s997_s16 = smov %s999_s5  ;;  %20 = sbr.rel (!%p18_p7) target bundleno = 8 (0x8), region = 89 }
  0xaf   :  { %345 = vsyncpa [#allocation3], 1 }
  0xb0   :  { %347 = vsyncpa [#allocation3 + $0x1], 1 }
  0xb1   :  { %348 = vsyncpa [#allocation4], 1 }
  0xb2   :  { %350 = vsyncpa [#allocation4 + $0x1], 1 }
  0xb3   :  { %351 = vsyncpa [#allocation5], 1 }
  0xb4   :  { %353 = vsyncpa [#allocation5 + $0x1], 1 }
  0xb5   :  { %354 = vsyncpa [#allocation6], 1 }
  0xb6   :  { %356 = vsyncpa [#allocation6 + $0x1], 1 }

</bundles_post_ra>
